<compile_context>
chip_gen: v7x
topology: tpu7x:2x2x1
jax: 0.10.0
libtpu: 0.0.40
codegen_flags: <defaults>
</compile_context>

<pallas_src>
import math

import jax
import jax.numpy as jnp
from jax.experimental import pallas as pl
from jax.experimental.pallas import tpu as pltpu


def _round_up(n, m):
    return ((n + m - 1) // m) * m


def _vmem_capacity_bytes():
    try:
        return int(pltpu.get_tpu_info().vmem_capacity_bytes)
    except Exception:
        return 64 << 20  # conservative (v7x-sized) fallback


def _sine_layer_kernel(x_ref, w_ref, b_ref, o_ref):
    # x_ref: (TILE_B, IN)  w_ref: (IN, OUT)  b_ref: (1, OUT)  o_ref: (TILE_B, OUT)
    # omega_0 is already folded into w/b by the wrapper.
    acc = jnp.dot(x_ref[...], w_ref[...], preferred_element_type=jnp.float32)
    o_ref[...] = jnp.sin(acc + b_ref[...]).astype(o_ref.dtype)


def sine_layer(x, weight, bias, omega_0=30.0, max_tile_b=1024, compute_dtype=None):
    """y = sin(omega_0 * (x @ weight.T + bias)); x: (..., in_features)."""
    orig_shape = x.shape
    out_dtype = x.dtype
    in_f = orig_shape[-1]
    out_f = weight.shape[0]
    x2 = x.reshape(-1, in_f)
    B = x2.shape[0]

    mm_dtype = jnp.dtype(compute_dtype) if compute_dtype is not None else jnp.dtype(x.dtype)

    # ---- weights: fold omega_0, transpose to MXU-native (K, N), pad only the
    # lane (output) dim to a multiple of 128 so output stores are unmasked.
    # For real SIREN widths (e.g. 256) the pad is a no-op.
    out_p = _round_up(out_f, 128)
    w = (weight.astype(jnp.float32) * omega_0).T            # (in_f, out_f)
    b = bias.astype(jnp.float32) * omega_0
    if out_p != out_f:
        w = jnp.pad(w, ((0, 0), (0, out_p - out_f)))
        b = jnp.pad(b, (0, out_p - out_f))
    w = w.astype(mm_dtype)
    b2 = b.reshape(1, out_p)                                  # bias add stays f32

    x2 = x2.astype(mm_dtype)

    x_isz = jnp.dtype(mm_dtype).itemsize
    w_isz = jnp.dtype(mm_dtype).itemsize
    o_isz = jnp.dtype(out_dtype).itemsize

    vmem_cap = _vmem_capacity_bytes()
    budget = (vmem_cap * 3) // 4                              # ~96 MiB v5e/v6e, ~48 MiB v7x

    def _vmem_need(tb, w_buffers):
        return (2 * tb * in_f * x_isz                         # x tiles, double-buffered
                + 2 * tb * out_p * o_isz                      # out tiles, double-buffered
                + w_buffers * in_f * out_p * w_isz            # resident weight
                + w_buffers * out_p * 4                       # resident bias (f32)
                + 2 * tb * out_p * 4)                         # f32 matmul / pre-sin temporaries

    # ---- batch tile sizing against the generation-gated VMEM budget
    tile_cap = min(max_tile_b, _round_up(B, 8))
    while tile_cap > 8 and _vmem_need(tile_cap, w_buffers=1) > budget:
        tile_cap = max(8, _round_up(tile_cap // 2, 8))

    n_tiles = pl.cdiv(B, tile_cap)
    if B > 8:
        n_tiles = max(n_tiles, 2)        # >=2 grid steps: megacore sharding + pipelining
    if n_tiles > 1 and n_tiles % 2 == 1:
        n_tiles += 1                     # even step count: balance the two v7x TCs
    tile_b = _round_up(pl.cdiv(B, n_tiles), 8)
    B_pad = n_tiles * tile_b

    if B_pad != B:                       # single pad of x (no K pad at all)
        x2 = jnp.pad(x2, ((0, B_pad - B), (0, 0)))

    vmem_limit = int(max(min(vmem_cap - (8 << 20),
                             _vmem_need(tile_b, w_buffers=2) + (8 << 20)),
                         32 << 20))

    def _build_call(single_buffer_resident):
        if single_buffer_resident:
            resident_kwargs = dict(pipeline_mode=pl.Buffered(1))
        else:
            resident_kwargs = {}
        return pl.pallas_call(
            _sine_layer_kernel,
            out_shape=jax.ShapeDtypeStruct((B_pad, out_p), out_dtype),
            grid_spec=pltpu.PrefetchScalarGridSpec(
                num_scalar_prefetch=0,
                grid=(B_pad // tile_b,),
                in_specs=[
                    # x streams with the grid; last dim == full array dim (no K pad needed)
                    pl.BlockSpec((tile_b, in_f), lambda i: (i, 0)),
                    # weight / bias: constant index_map -> VMEM resident, single-buffered
                    pl.BlockSpec((in_f, out_p), lambda i: (0, 0), **resident_kwargs),
                    pl.BlockSpec((1, out_p), lambda i: (0, 0), **resident_kwargs),
                ],
                out_specs=pl.BlockSpec((tile_b, out_p), lambda i: (i, 0)),
            ),
            compiler_params=pltpu.CompilerParams(
                dimension_semantics=("parallel",),   # batch axis: megacore-shardable
                vmem_limit_bytes=vmem_limit,
            ),
        )

    try:
        out = _build_call(True)(x2, w, b2)
    except Exception:
        # Fallback for JAX builds that reject single-buffered pipeline_mode.
        out = _build_call(False)(x2, w, b2)

    out = out[:B, :out_f]
    return out.reshape(*orig_shape[:-1], out_f)


def init_sine_layer_params(key, in_features, out_features, is_first=False,
                           omega_0=30.0, dtype=jnp.float32):
    """Deterministic init matching SineLayer.init_weights semantics."""
    kw, kb = jax.random.split(key)
    if is_first:
        bound = 1.0 / in_features
    else:
        bound = math.sqrt(6.0 / in_features) / omega_0
    weight = jax.random.uniform(kw, (out_features, in_features),
                                minval=-bound, maxval=bound, dtype=dtype)
    # nn.Linear default bias init: U(-1/sqrt(in), 1/sqrt(in))
    b_bound = 1.0 / math.sqrt(in_features)
    bias = jax.random.uniform(kb, (out_features,),
                              minval=-b_bound, maxval=b_bound, dtype=dtype)
    return weight, bias


if __name__ == "__main__":
    key = jax.random.PRNGKey(0)
    kx, kp = jax.random.split(key)

    # Small demo shapes; batch=12 / in=32 / out=64 exercise the batch-pad,
    # output lane-pad, and multi-tile (grid>=2) paths.
    batch, in_features, out_features = 12, 32, 64
    omega_0 = 30.0

    x = jax.random.normal(kx, (batch, in_features), dtype=jnp.float32)
    weight, bias = init_sine_layer_params(kp, in_features, out_features,
                                          is_first=True, omega_0=omega_0)

    # reference in plain JAX
    ref = jnp.sin(omega_0 * (x @ weight.T + bias))

    # f32 path (exact)
    out = jax.block_until_ready(sine_layer(x, weight, bias, omega_0=omega_0))
    assert out.shape == (batch, out_features)
    assert jnp.allclose(out, ref, atol=1e-5, rtol=1e-5), "f32 mismatch vs reference"

    # bf16-matmul path (HBM-bound layer: halves streamed bytes; f32 accumulate + sin)
    out_bf16 = jax.block_until_ready(
        sine_layer(x, weight, bias, omega_0=omega_0, compute_dtype=jnp.bfloat16))
    assert out_bf16.shape == (batch, out_features)
    assert jnp.allclose(out_bf16, ref, atol=0.15), "bf16 path mismatch vs reference"

    print("KERNEL_OK")
</pallas_src>

<mosaic_0001>
module attributes {stable_mosaic.version = 11 : i64} {
  func.func @_sine_layer_kernel(%arg0: i32, %arg1: memref<8x32xf32, #tpu.memory_space<vmem>>, %arg2: memref<32x128xf32, #tpu.memory_space<vmem>>, %arg3: memref<1x128xf32, #tpu.memory_space<vmem>>, %arg4: memref<8x128xf32, #tpu.memory_space<vmem>>) attributes {dimension_semantics = [#tpu.dimension_semantics<parallel>], iteration_bounds = array<i64: 2>, scalar_prefetch = 0 : i64, scratch_operands = 0 : i64, tpu.core_type = #tpu.core_type<tc>, window_params = [{transform_indices = @transform_0, window_bounds = array<i64: 8, 32>}, {pipeline_mode = #tpu.pipeline_mode<synchronous>, transform_indices = @transform_1, window_bounds = array<i64: 32, 128>}, {pipeline_mode = #tpu.pipeline_mode<synchronous>, transform_indices = @transform_2, window_bounds = array<i64: 1, 128>}, {transform_indices = @transform_3, window_bounds = array<i64: 8, 128>}]} {
    %c0 = arith.constant 0 : index
    %c0_0 = arith.constant 0 : index
    %0 = vector.load %arg1[%c0, %c0_0] : memref<8x32xf32, #tpu.memory_space<vmem>>, vector<8x32xf32>
    %c0_1 = arith.constant 0 : index
    %c0_2 = arith.constant 0 : index
    %1 = vector.load %arg2[%c0_1, %c0_2] : memref<32x128xf32, #tpu.memory_space<vmem>>, vector<32x128xf32>
    %cst = arith.constant dense<0.000000e+00> : vector<8x128xf32>
    %2 = tpu.matmul %0, %1, %cst {dimension_numbers = #tpu.dot_dimension_numbers<[1], [0], [0], [1], [0, 0, 1, 1], [], []>} : vector<8x32xf32>, vector<32x128xf32>, vector<8x128xf32> -> vector<8x128xf32>
    %c0_3 = arith.constant 0 : index
    %c0_4 = arith.constant 0 : index
    %3 = vector.load %arg3[%c0_3, %c0_4] : memref<1x128xf32, #tpu.memory_space<vmem>>, vector<1x128xf32>
    %4 = vector.broadcast %3 : vector<1x128xf32> to vector<8x128xf32>
    %5 = arith.addf %2, %4 : vector<8x128xf32>
    %6 = math.sin %5 : vector<8x128xf32>
    %c0_5 = arith.constant 0 : index
    %c0_6 = arith.constant 0 : index
    %7 = vector.load %arg4[%c0_5, %c0_6] : memref<8x128xf32, #tpu.memory_space<vmem>>, vector<8x128xf32>
    tpu.vector_store %arg4[%c0_5, %c0_6], %6 {strides = array<i32>} : memref<8x128xf32, #tpu.memory_space<vmem>>, vector<8x128xf32>,
    return
  }
  func.func @transform_0(%arg0: i32) -> (i32, i32) {
    %c0_i32 = arith.constant 0 : i32
    %c0_i32_0 = arith.constant 0 : i32
    return %arg0, %c0_i32 : i32, i32
  }
  func.func @transform_1(%arg0: i32) -> (i32, i32) {
    %c0_i32 = arith.constant 0 : i32
    %c0_i32_0 = arith.constant 0 : i32
    %c0_i32_1 = arith.constant 0 : i32
    return %c0_i32, %c0_i32_0 : i32, i32
  }
  func.func @transform_2(%arg0: i32) -> (i32, i32) {
    %c0_i32 = arith.constant 0 : i32
    %c0_i32_0 = arith.constant 0 : i32
    %c0_i32_1 = arith.constant 0 : i32
    return %c0_i32, %c0_i32_0 : i32, i32
  }
  func.func @transform_3(%arg0: i32) -> (i32, i32) {
    %c0_i32 = arith.constant 0 : i32
    %c0_i32_0 = arith.constant 0 : i32
    return %arg0, %c0_i32 : i32, i32
  }
}

module attributes {stable_mosaic.version = 11 : i64} {
  func.func @_sine_layer_kernel(%arg0: i32, %arg1: memref<8x32xf32, #tpu.memory_space<vmem>>, %arg2: memref<32x128xf32, #tpu.memory_space<vmem>>, %arg3: memref<1x128xf32, #tpu.memory_space<vmem>>, %arg4: memref<8x128xf32, #tpu.memory_space<vmem>>) attributes {dimension_semantics = [#tpu.dimension_semantics<parallel>], iteration_bounds = array<i64: 2>, scalar_prefetch = 0 : i64, scratch_operands = 0 : i64, tpu.core_type = #tpu.core_type<tc>, window_params = [{transform_indices = @transform_0, window_bounds = array<i64: 8, 32>}, {pipeline_mode = #tpu.pipeline_mode<synchronous>, transform_indices = @transform_1, window_bounds = array<i64: 32, 128>}, {pipeline_mode = #tpu.pipeline_mode<synchronous>, transform_indices = @transform_2, window_bounds = array<i64: 1, 128>}, {transform_indices = @transform_3, window_bounds = array<i64: 8, 128>}]} {
    %c0 = arith.constant 0 : index
    %c0_0 = arith.constant 0 : index
    %0 = vector.load %arg1[%c0, %c0_0] : memref<8x32xf32, #tpu.memory_space<vmem>>, vector<8x32xf32>
    %c0_1 = arith.constant 0 : index
    %c0_2 = arith.constant 0 : index
    %1 = vector.load %arg2[%c0_1, %c0_2] : memref<32x128xf32, #tpu.memory_space<vmem>>, vector<32x128xf32>
    %cst = arith.constant dense<0.000000e+00> : vector<8x128xf32>
    %2 = tpu.matmul %0, %1, %cst {dimension_numbers = #tpu.dot_dimension_numbers<[1], [0], [0], [1], [0, 0, 1, 1], [], []>} : vector<8x32xf32>, vector<32x128xf32>, vector<8x128xf32> -> vector<8x128xf32>
    %c0_3 = arith.constant 0 : index
    %c0_4 = arith.constant 0 : index
    %3 = vector.load %arg3[%c0_3, %c0_4] : memref<1x128xf32, #tpu.memory_space<vmem>>, vector<1x128xf32>
    %4 = vector.broadcast %3 : vector<1x128xf32> to vector<8x128xf32>
    %5 = arith.addf %2, %4 : vector<8x128xf32>
    %6 = math.sin %5 : vector<8x128xf32>
    %c0_5 = arith.constant 0 : index
    %c0_6 = arith.constant 0 : index
    %7 = vector.load %arg4[%c0_5, %c0_6] : memref<8x128xf32, #tpu.memory_space<vmem>>, vector<8x128xf32>
    tpu.vector_store %arg4[%c0_5, %c0_6], %6 {strides = array<i32>} : memref<8x128xf32, #tpu.memory_space<vmem>>, vector<8x128xf32>,
    return
  }
  func.func @transform_0(%arg0: i32) -> (i32, i32) {
    %c0_i32 = arith.constant 0 : i32
    %c0_i32_0 = arith.constant 0 : i32
    return %arg0, %c0_i32 : i32, i32
  }
  func.func @transform_1(%arg0: i32) -> (i32, i32) {
    %c0_i32 = arith.constant 0 : i32
    %c0_i32_0 = arith.constant 0 : i32
    %c0_i32_1 = arith.constant 0 : i32
    return %c0_i32, %c0_i32_0 : i32, i32
  }
  func.func @transform_2(%arg0: i32) -> (i32, i32) {
    %c0_i32 = arith.constant 0 : i32
    %c0_i32_0 = arith.constant 0 : i32
    %c0_i32_1 = arith.constant 0 : i32
    return %c0_i32, %c0_i32_0 : i32, i32
  }
  func.func @transform_3(%arg0: i32) -> (i32, i32) {
    %c0_i32 = arith.constant 0 : i32
    %c0_i32_0 = arith.constant 0 : i32
    return %arg0, %c0_i32 : i32, i32
  }
}

</mosaic_0001>

<bundles_post_ra>
// kernel: tpu_custom_call.1
= control target key start
LH: loop header
LB: loop body
LE: loop exit
PB: predicated region body
PF: predicated region fallthrough
CT: control target
= control target key end

     0   :  { %8 = vsyncpa [#allocation3], 0  ;;  %s992_s0 = inlined_call_operand.hbm [shape: f32[16,32], index: 0, kind: input, shape index: {}]   ;;  %s993_s1 = inlined_call_operand.hbm [shape: f32[32,128], index: 1, kind: input, shape index: {}]   ;;  %s994_s2 = inlined_call_operand.vmem [shape: f32[1,128], index: 2, kind: input, shape index: {}]   ;;  %s995_s3 = inlined_call_operand.hbm [shape: f32[16,128], index: 3, kind: output, shape index: {}]  }
   0x1   :  { %10 = vsyncpa [#allocation3 + $0x1], 0 }
   0x2   :  { %11 = vsyncpa [#allocation6], 0 }
   0x3   :  { %12 = vsyncpa [#allocation4], 0 }
   0x4   :  { %14 = vsyncpa [#allocation4 + $0x1], 0  ;;  %s768_s12 = smov 0   ;;  %s770_s13 = smov 0  }
   0x5   :  { %s772_s14 = smov 0   ;;  %s774_s15 = smov 0  }
   0x6 LB: > { %s789_s16 = sadd.s32 4294967295, %s732_s15   ;;  %s486_s17 = sadd.s32 4294967294, %s732_s15   ;;  %s732_s15 = sphi %s774_s15, %s1015_s15   ;;  %s728_s14 = sphi %s772_s14, %s1014_s14   ;;  %s724_s13 = sphi %s770_s13, %s1013_s13   ;;  %s720_s12 = sphi %s768_s12, %s1012_s12  }
   0x7   : > { %p40_p0 = scmp.ne.s32.totalorder %s724_s13, %s720_s12  ;;  %p996_p1 = scmp.eq.s32.totalorder %s789_s16, 0 }
   0x8   : > { %p112_p3 = scmp.eq.s32.totalorder %s486_s17, 1  ;;  %p487_p5 = scmp.ge.s32.totalorder %s732_s15, 1 }
   0x9   : > { %p798_p4 = por %p996_p1, %p40_p0  ;;  %p119_p7 = scmp.lt.s32.totalorder %s732_s15, 3 }
   0xa   : > { %p803_p6 = por %p112_p3, %p40_p0  ;;  %s734_s21 = smov [#allocation5]  }
   0xb   : > { %s999_s18 = scalar_select %p798_p4, 1, 0 }
   0xc   : > { %s1000_s19 = scalar_select %p803_p6, 1, 0 }
   0xd   : > { %p808_p8 = pnand %p487_p5, %p119_p7  ;;  %s131_s22 = sshll.u32 %s734_s21, 4  ;;  %s812_s22 = int_to_ptr.vmem [resolvable:$true] %s131_s22 }
   0xe   : > { %s824_s24 = sadd.s32 1, %s732_s15   ;;  %s27_s25 = sadd.s32 1, %s728_s14 }
   0xf   : > { %s1001_s20 = scalar_select %p808_p8, 1, 0 }
  0x10   : > { %p540_p9 = pneg %p808_p8  ;;  %s24_s26 = ssub.s32 %s732_s15, %s824_s24 }
  0x11   : > { %s604_s29 = scalar_lea.hbm %s993_s1, 512 }
  0x12   : > { %p819_p11 = pnand %p540_p9, %p996_p1  ;;  %p605_p12 = scmp.ne.s32.totalorder %s993_s1, %s604_s29 }
  0x13   : > { %p611_p5 = scmp.lt.u32.totalorder %s604_s29, %s993_s1 }
  0x14   : > { %p606_p13 = pneg %p819_p11 }
  0x16   : > { %p607_p0 = pnand %p606_p13, %p605_p12 }
  0x18   : > { %p608_p3 = pneg %p607_p0 }
  0x1a   : > { %p613_p7 = pnand %p611_p5, %p608_p3 }
  0x1c   : > { %616 = shalt.err (!%p613_p7)
}
  0x1d   : > { %s617_s7 = scalar_lea.vmem %s812_s22, 512  ;;  %p625_p2 = scmp.lt.s32.totalorder %s812_s22, %s812_s22 }
  0x1e   : > { %p618_p9 = scmp.ne.s32.totalorder %s812_s22, %s617_s7  ;;  %p626_p6 = scmp.lt.s32.totalorder %s617_s7, %s617_s7 }
  0x20   : > { %p620_p10 = pnand %p618_p9, %p606_p13  ;;  %p627_p4 = por %p626_p6, %p625_p2 }
  0x22   : > { %p621_p1 = pneg %p620_p10 }
  0x24   : > { %p628_p8 = pnand %p627_p4, %p621_p1 }
  0x26   : > { %631 = shalt.err (!%p628_p8)
}
  0x27   : > { %s735_s8 = smov 128   ;;  %s736_s9 = smov 8  }
  0x28   : > { %543 = dma.hbm_to_vmem [thread:$0]  (!%p819_p11), %s993_s1, 512, %s812_s22, [#allocation6], %s735_s8, %s735_s8, %s736_s9  }
  0x29   : > { %p25_p2 = scmp.eq.s32.totalorder %s24_s26, 0  ;;  %p34_p1 = scmp.ne.s32.totalorder %s728_s14, %s724_s13 }
  0x2a   : > { %p35_p4 = scmp.eq.s32.totalorder %s732_s15, 0  ;;  %p553_p6 = scmp.lt.s32.totalorder %s732_s15, 2 }
  0x2b   : > { %s855_s17 = scalar_select %p25_p2, %s728_s14, %s27_s25  }
  0x2c   : > { %p36_p8 = por %p35_p4, %p34_p1  ;;  %p1003_p10 = scmp.eq.s32.totalorder %s789_s16, 1 }
  0x2d   : > { %s148_s27 = sand.u32 1, %s728_s14   ;;  %s491_s28 = sshll.u32 %s732_s15, 7 }
  0x2e   : > { %p859_p12 = por %p1003_p10, %p34_p1  ;;  %s490_s29 = sshll.u32 %s148_s27, 3 }
  0x2f   : > { %s868_s4 = scalar_lea.hbm %s992_s0, %s491_s28  ;;  %s152_s22 = scalar_lea.vmem [#allocation2], %s490_s29 }
  0x30   : > { %s159_s25 = sshll.u32 %s152_s22, 4  ;;  %p870_p11 = pnand %p553_p6, %p36_p8  ;;  %s874_s25 = int_to_ptr.vmem [resolvable:$true] %s159_s25 }
  0x31   : > { %s149_s5 = scalar_lea.sflag [#allocation3], %s148_s27  ;;  %s632_s6 = scalar_lea.hbm %s868_s4, 128 }
  0x32   : > { %p633_p13 = scmp.ne.s32.totalorder %s868_s4, %s632_s6  ;;  %p634_p0 = pneg %p870_p11 }
  0x33   : > { %s637_s9 = scalar_lea.hbm %s992_s0, 256  ;;  %p638_p7 = scmp.lt.u32.totalorder %s868_s4, %s992_s0 }
  0x34   : > { %p635_p3 = pnand %p634_p0, %p633_p13  ;;  %p639_p9 = scmp.lt.u32.totalorder %s637_s9, %s632_s6 }
  0x35   : > { %p641_p1 = scmp.lt.u32.totalorder %s632_s6, %s868_s4 }
  0x36   : > { %p636_p5 = pneg %p635_p3  ;;  %p640_p2 = por %p639_p9, %p638_p7 }
  0x38   : > { %p642_p4 = por %p641_p1, %p640_p2 }
  0x3a   : > { %p643_p6 = pnand %p642_p4, %p636_p5 }
  0x3c   : > { %646 = shalt.err (!%p643_p6)
}
  0x3d   : > { %s647_s27 = scalar_lea.vmem %s874_s25, 128  ;;  %s737_s28 = smov [#allocation2]  }
  0x3e   : > { %p648_p8 = scmp.ne.s32.totalorder %s874_s25, %s647_s27  ;;  %s652_s29 = sshll.u32 %s737_s28, 4  ;;  %s653_s29 = int_to_ptr.vmem [resolvable:$false] %s652_s29 }
  0x3f   : > { %s654_s23 = scalar_lea.vmem %s653_s29, 256  ;;  %p655_p3 = scmp.lt.s32.totalorder %s874_s25, %s653_s29 }
  0x40   : > { %p650_p10 = pnand %p648_p8, %p634_p0  ;;  %p656_p7 = scmp.lt.s32.totalorder %s654_s23, %s647_s27 }
  0x42   : > { %p651_p13 = pneg %p650_p10  ;;  %p657_p9 = por %p656_p7, %p655_p3 }
  0x44   : > { %p658_p2 = pnand %p657_p9, %p651_p13 }
  0x46   : > { %661 = shalt.err (!%p658_p2)
}
  0x47   : > { %547 = dma.hbm_to_vmem [thread:$0]  (!%p870_p11), %s868_s4, 128, %s874_s25, %s149_s5  }
  0x48   : > { %p1006_p5 = scmp.ne.s32.totalorder %s1001_s20, 0 }
  0x49   : > { %s904_s30 = sand.u32 (!%p1006_p5), 1, %s724_s13   ;;  %p1007_p0 = scmp.ne.s32.totalorder (!%p1006_p5), %s999_s18, 0 }
  0x4a   : > { %168 = sbr.rel (%p1006_p5) target bundleno = 402 (0x192), region = 32  ;;  %s493_s22 = sshll.u32 (!%p1006_p5), %s904_s30, 3 }
  0x4b   : > { %s171_s6 = scalar_lea.sflag (!%p1006_p5), [#allocation3], %s904_s30  ;;  %s174_s7 = scalar_lea.vmem (!%p1006_p5), [#allocation2], %s493_s22 }
  0x51   : > { %707 = dma.done.wait (%p1007_p0), %s171_s6, 128  }
  0x52   : > { %709 = vsyncadd (%p1007_p0), %s171_s6, 4294967168  ;;  %p1008_p11 = scmp.eq.s32.totalorder %s789_s16, 0 }
  0x54   : > { %711 = dma.done.wait (%p1008_p11), [#allocation6], 512   ;;  %p1009_p1 = pmov %p1008_p11 }
  0x55   : > { %v738_v0 = vmov 0.0|0.0   ;;  %vm739_vm0 = vmmov 0   ;;  %v740_v1 = vmov 0.0   ;;  %v202_v2 = vld [vmem:[#allocation5] sm:$0xff]  ;;  %v203_v3 = vld [vmem:[#allocation5 + $0x8] sm:$0xff]  ;;  %v204_v4 = vld [vmem:[#allocation5 + $0x10] sm:$0xff] }
  0x56   : > { %713 = vsyncadd (%p1009_p1), [#allocation6], 4294966784  ;;  %522 = vmatprep.subr.bf16.mxu0 %v738_v0  ;;  %519 = vmatprep.mubr.msk.f32.mxu0 %vm739_vm0, %v740_v1  ;;  %v523_v5 = vpack.c.bf16 %v203_v3, %v202_v2  ;;  %v205_v6 = vld [vmem:[#allocation5 + $0x18] sm:$0xff]  ;;  %vm213_vm1 = vcmask 261120   ;;  %v496_v9 = vld [vmem:[%s994_s2] ss:$0 sm:$0xff] }
  0x57   : > { %v526_v7 = vpack.c.bf16 %v205_v6, %v204_v4  ;;  %v201_v8 = vld [vmem:[%s174_s7] sm:$0xff]  ;;  %v741_v23 = vmov 683565275   ;;  %v742_v25 = vmov 2475754826   ;;  %s503_s4 = sshll.u32 %s789_s16, 7 }
  0x58   : > { %524 = vmatpush3.bf16.msra.mxu0 %v523_v5  ;;  %v743_v28 = vmov 2131351028   ;;  %v744_v31 = vmov 2102212464   ;;  %v745_v34 = vmov 920167782   ;;  %s948_s9 = scalar_lea.hbm %s995_s3, %s503_s4 }
  0x59   : > { %525 = vmatprep.subr.bf16.mxu0 %v738_v0  ;;  %v746_v37 = vmov 1326507024   ;;  %s200_s25 = scalar_lea.vmem [#allocation7], %s493_s22  ;;  %s393_s16 = scalar_lea.sflag [#allocation4], %s904_s30 }
  0x5a   : > { %s406_s26 = sshll.u32 %s200_s25, 4  ;;  %s747_s11 = smov [#allocation7]   ;;  %s950_s26 = int_to_ptr.vmem [resolvable:$true] %s406_s26 }
  0x5b   : > { %s662_s10 = scalar_lea.vmem %s950_s26, 128  ;;  %s666_s27 = sshll.u32 %s747_s11, 4  ;;  %s667_s27 = int_to_ptr.vmem [resolvable:$false] %s666_s27 }
  0x5c   : > { %527 = vmatpush3.bf16.msra.mxu0 %v526_v7  ;;  %p663_p4 = scmp.ne.s32.totalorder %s950_s26, %s662_s10  ;;  %s668_s28 = scalar_lea.vmem %s667_s27, 256 }
  0x5d   : > { %p669_p10 = scmp.lt.s32.totalorder %s950_s26, %s667_s27  ;;  %p670_p13 = scmp.lt.s32.totalorder %s668_s28, %s662_s10 }
  0x5e   : > { %p664_p6 = pnand %p663_p4, %p859_p12 }
  0x5f   : > { %520 = vmatmul.mubr.msk.f32.vlgmr.msra.gmra.mrb[0].mxu0 %vm213_vm1, %v201_v8  ;;  %p671_p3 = por %p670_p13, %p669_p10 }
  0x60   : > { %p665_p8 = pneg %p664_p6 }
  0x62   : > { %p672_p7 = pnand %p671_p3, %p665_p8 }
 0x132   : > { %v283_v10 = vpop.f32.mrb[0].mxu0 }
 0x133   : > { %v921_v11 = vadd.f32 %v496_v9, %v283_v10  ;;  %v521_v12 = vpop.f32.mrb[1].mxu0 }
 0x135   : > { %v290_v13 = vand.u32 2139095040, %v921_v11  ;;  %v287_v17 = vand.u32 2147483647, %v921_v11  ;;  %vm289_vm9 = vcmp.lt.s32.totalorder %v921_v11, 0  ;;  %vm379_vm14 = vweird.f32 %v921_v11 }
 0x137   : > { %v291_v14 = vshrl.u32 %v290_v13, 23  ;;  %v294_v20 = vand.u32 8388607, %v287_v17  ;;  %vm288_vm10 = vcmp.le.f32.partialorder %v287_v17, 0.7853982 }
 0x139   : > { %v498_v15 = vadd.s32 4294967169, %v291_v14  ;;  %v295_v39 = vor.u32 8388608, %v294_v20 }
 0x13b   : > { %v297_v16 = vadd.s32 1, %v498_v15  ;;  %v335_v53 = vshll.u32 %v295_v39, 8 }
 0x13d   : > { %vm298_vm2 = vcmp.gt.s32.totalorder %v297_v16, 0 }
 0x13e   : > { %v299_v18 = vsel %vm298_vm2, %v297_v16, 0 }
 0x13f   : > { %v301_v19 = vand.u32 31, %v299_v18  ;;  %v300_v22 = vshrl.u32 %v299_v18, 5 }
 0x141   : > { %v302_v21 = vsub.s32 32, %v301_v19  ;;  %v304_v24 = vshll.u32 %v741_v23, %v301_v19  ;;  %v307_v26 = vshll.u32 %v742_v25, %v301_v19  ;;  %v310_v30 = vshll.u32 %v743_v28, %v301_v19 }
 0x142   : > { %v313_v33 = vshll.u32 %v744_v31, %v301_v19  ;;  %v316_v36 = vshll.u32 %v745_v34, %v301_v19  ;;  %vm319_vm3 = vcmp.lt.s32.totalorder %v300_v22, 1  ;;  %vm322_vm4 = vcmp.lt.s32.totalorder %v300_v22, 4 }
 0x143   : > { %v305_v27 = vshrl.u32 %v742_v25, %v302_v21  ;;  %v308_v29 = vshrl.u32 %v743_v28, %v302_v21  ;;  %v311_v32 = vshrl.u32 %v744_v31, %v302_v21  ;;  %v314_v35 = vshrl.u32 %v745_v34, %v302_v21 }
 0x144   : > { %v317_v38 = vshrl.u32 %v746_v37, %v302_v21  ;;  %v303_v48 = vshrl.u32 %v741_v23, %v302_v21  ;;  %vm321_vm5 = vcmp.lt.s32.totalorder %v300_v22, 3  ;;  %vm320_vm6 = vcmp.lt.s32.totalorder %v300_v22, 2 }
 0x145   : > { %v306_v40 = vor.u32 %v305_v27, %v304_v24  ;;  %v309_v41 = vor.u32 %v308_v29, %v307_v26  ;;  %v312_v42 = vor.u32 %v311_v32, %v310_v30  ;;  %v315_v43 = vor.u32 %v314_v35, %v313_v33 }
 0x146   : > { %v318_v44 = vor.u32 %v317_v38, %v316_v36 }
 0x147   : > { %v324_v45 = vsel %vm322_vm4, %v312_v42, 2102212464  ;;  %v327_v46 = vsel %vm319_vm3, %v306_v40, %v309_v41  ;;  %v331_v47 = vsel %vm319_vm3, %v309_v41, %v312_v42  ;;  %v328_v49 = vsel %vm322_vm4, %v315_v43, 920167782 }
 0x148   : > { %v332_v50 = vsel %vm322_vm4, %v318_v44, 1326507024  ;;  %v329_v51 = vsel %vm321_vm5, %v312_v42, %v328_v49  ;;  %v323_v54 = vsel %vm319_vm3, %v303_v48, %v306_v40  ;;  %v325_v55 = vsel %vm321_vm5, %v309_v41, %v324_v45 }
 0x149   : > { %v333_v52 = vsel %vm321_vm5, %v315_v43, %v332_v50  ;;  %v330_v56 = vsel %vm320_vm6, %v327_v46, %v329_v51  ;;  %v326_v62 = vsel %vm320_vm6, %v323_v54, %v325_v55 }
 0x14a   : > { %v334_v57 = vsel %vm320_vm6, %v331_v47, %v333_v52  ;;  %v930_v60 = vmul.u32.u64.low %v335_v53, %v330_v56  ;;  %v931_v61 = vmul.u32.u64.high %v335_v53, %v330_v56, %v930_v60  ;;  %v342_v0 = vmul.u32 %v335_v53, %v326_v62 }
 0x14b   : > { %v927_v58 = vmul.u32.u64.low %v335_v53, %v334_v57  ;;  %v928_v59 = vmul.u32.u64.high %v335_v53, %v334_v57, %v927_v58 }
 0x14c   : > { %v345_v63 = vadd.s32 1, %v931_v61 }
 0x14d   : > { %vm344_vm7 = vc.u32 %v928_v59, %v930_v60  ;;  %v343_v13 = vadd.s32 %v930_v60, %v928_v59 }
 0x14e   : > { %v346_v1 = vsel %vm344_vm7, %v345_v63, %v931_v61 }
 0x14f   : > { %v347_v2 = vadd.s32 %v346_v1, %v342_v0 }
 0x151   : > { %v348_v3 = vadd.s32 536870912, %v347_v2 }
 0x153   : > { %v349_v4 = vshrl.u32 %v348_v3, 30 }
 0x155   : > { %v350_v5 = vshll.u32 %v349_v4, 30  ;;  %v373_v26 = vsub.s32 4, %v349_v4 }
 0x157   : > { %v351_v6 = vsub.s32 %v347_v2, %v350_v5  ;;  %v374_v29 = vsel %vm289_vm9, %v373_v26, %v349_v4 }
 0x158   : > { %v376_v31 = vsel %vm288_vm10, 0, %v374_v29 }
 0x159   : > { %v353_v7 = vsub.s32 0, %v351_v6  ;;  %v380_v32 = vadd.s32 3, %v376_v31 }
 0x15b   : > { %v499_v8 = vmin.u32 %v353_v7, %v351_v6  ;;  %v381_v33 = vand.u32 3, %v380_v32 }
 0x15d   : > { %v355_v9 = vclz %v499_v8  ;;  %vm386_vm11 = vcmp.eq.s32.totalorder %v381_v33, 2  ;;  %vm383_vm12 = vcmp.eq.s32.totalorder %v381_v33, 0  ;;  %vm382_vm13 = vcmp.lt.s32.totalorder %v381_v33, 2 }
 0x15f   : > { %v500_v10 = vadd.s32 4294967294, %v355_v9 }
 0x161   : > { %vm501_vm8 = vcmp.lt.s32.totalorder %v500_v10, 0 }
 0x162   : > { %v358_v12 = vsel %vm501_vm8, 0, %v500_v10 }
 0x163   : > { %v359_v14 = vsub.s32 32, %v358_v12  ;;  %v363_v15 = vsub.s32 4294967266, %v358_v12  ;;  %v360_v16 = vshll.u32 %v351_v6, %v358_v12 }
 0x165   : > { %v361_v18 = vshrl.u32 %v343_v13, %v359_v14  ;;  %v364_v19 = vadd.s32 127, %v363_v15 }
 0x167   : > { %v362_v20 = vor.u32 %v361_v18, %v360_v16  ;;  %v365_v21 = vshll.u32 %v364_v19, 23 }
 0x169   : > { %v366_v22 = vor.u32 4788187, %v365_v21  ;;  %v369_v24 = vcvt.s32.f32 %v362_v20 }
 0x16b   : > { %v367_v23 = vand.u32 2147483647, %v366_v22 }
 0x16d   : > { %v370_v25 = vmul.f32 %v369_v24, %v367_v23 }
 0x16f   : > { %v371_v27 = vxor.u32 2147483648, %v370_v25 }
 0x171   : > { %v372_v28 = vsel %vm289_vm9, %v371_v27, %v370_v25 }
 0x172   : > { %v375_v30 = vsel %vm288_vm10, %v921_v11, %v372_v28 }
 0x173   : > { %600 = vcosq.f32 %v375_v30 }
 0x174   : > { %602 = vsinq.f32 %v375_v30 }
 0x17d   : > { %v601_v34 = vpop.eup %600 }
 0x17e   : > { %v603_v35 = vpop.eup %602  ;;  %v387_v36 = vxor.u32 2147483648, %v601_v34 }
 0x17f   : > { %v384_v37 = vxor.u32 2147483648, %v603_v35 }
 0x180   : > { %v388_v17 = vsel %vm386_vm11, %v387_v36, %v603_v35 }
 0x181   : > { %v385_v38 = vsel %vm383_vm12, %v601_v34, %v384_v37 }
 0x182   : > { %v389_v39 = vsel %vm382_vm13, %v385_v38, %v388_v17 }
 0x183   : > { %v390_v40 = vsel %vm379_vm14, nan, %v389_v39 }
 0x184   : > { %391 = vst [vmem:[%s200_s25] sm:$0xff] %v390_v40 }
 0x185   : > { %675 = shalt.err (!%p672_p7)
}
 0x186   : > { %s676_s29 = scalar_lea.hbm %s948_s9, 128  ;;  %s680_s22 = scalar_lea.hbm %s995_s3, 256 }
 0x187   : > { %p677_p9 = scmp.ne.s32.totalorder %s948_s9, %s676_s29  ;;  %p681_p0 = scmp.lt.u32.totalorder %s948_s9, %s995_s3 }
 0x188   : > { %p682_p11 = scmp.lt.u32.totalorder %s680_s22, %s676_s29  ;;  %p684_p4 = scmp.lt.u32.totalorder %s676_s29, %s948_s9 }
 0x189   : > { %p678_p2 = pnand %p677_p9, %p859_p12 }
 0x18a   : > { %p683_p1 = por %p682_p11, %p681_p0 }
 0x18b   : > { %p679_p5 = pneg %p678_p2 }
 0x18c   : > { %p685_p6 = por %p684_p4, %p683_p1 }
 0x18e   : > { %p686_p8 = pnand %p685_p6, %p679_p5 }
 0x190   : > { %689 = shalt.err (!%p686_p8)
}
 0x191   : > { %538 = dma.vmem_to_hbm [thread:$0]  (%p859_p12), %s950_s26, 128, %s948_s9, %s393_s16  }
 0x192 PF: > { %s418_s18 = sand.u32 1, %s720_s12   ;;  %p1010_p10 = scmp.ne.s32.totalorder %s1000_s19, 0 }
 0x193   : > { %p1011_p13 = scmp.ge.s32.totalorder %s732_s15, 2  ;;  %s419_s20 = scalar_lea.sflag [#allocation4], %s418_s18 }
 0x195   : > { %p549_p3 = pnand %p1011_p13, %p1010_p10 }
 0x197   : > { %715 = dma.done.wait (!%p549_p3), %s419_s20, 128  }
 0x198   : > { %717 = vsyncadd (!%p549_p3), %s419_s20, 4294967168  ;;  %p17_p7 = scmp.ge.s32.totalorder %s824_s24, 4   ;;  %s1012_s12 = smov %s724_s13 }
 0x199   : > { %s1013_s13 = smov %s728_s14  ;;  %s1014_s14 = smov %s855_s17 }
 0x19a   : > { %s1015_s15 = smov %s824_s24  ;;  %19 = sbr.rel (!%p17_p7) target bundleno = 6 (0x6), region = 81 }
 0x1a1   :  { %424 = vsyncpa [#allocation3], 1 }
 0x1a2   :  { %426 = vsyncpa [#allocation3 + $0x1], 1 }
 0x1a3   :  { %427 = vsyncpa [#allocation6], 1 }
 0x1a4   :  { %428 = vsyncpa [#allocation4], 1 }
 0x1a5   :  { %430 = vsyncpa [#allocation4 + $0x1], 1 }

// kernel: tpu_custom_call.1
= control target key start
LH: loop header
LB: loop body
LE: loop exit
PB: predicated region body
PF: predicated region fallthrough
CT: control target
= control target key end

     0   :  { %8 = vsyncpa [#allocation3], 0  ;;  %s992_s0 = inlined_call_operand.hbm [shape: f32[16,32], index: 0, kind: input, shape index: {}]   ;;  %s993_s1 = inlined_call_operand.hbm [shape: f32[32,128], index: 1, kind: input, shape index: {}]   ;;  %s994_s2 = inlined_call_operand.vmem [shape: f32[1,128], index: 2, kind: input, shape index: {}]   ;;  %s995_s3 = inlined_call_operand.hbm [shape: f32[16,128], index: 3, kind: output, shape index: {}]  }
   0x1   :  { %10 = vsyncpa [#allocation3 + $0x1], 0 }
   0x2   :  { %11 = vsyncpa [#allocation6], 0 }
   0x3   :  { %12 = vsyncpa [#allocation4], 0 }
   0x4   :  { %14 = vsyncpa [#allocation4 + $0x1], 0  ;;  %s768_s12 = smov 0   ;;  %s770_s13 = smov 0  }
   0x5   :  { %s772_s14 = smov 0   ;;  %s774_s15 = smov 0  }
   0x6 LB: > { %s789_s16 = sadd.s32 4294967295, %s732_s15   ;;  %s486_s17 = sadd.s32 4294967294, %s732_s15   ;;  %s732_s15 = sphi %s774_s15, %s1015_s15   ;;  %s728_s14 = sphi %s772_s14, %s1014_s14   ;;  %s724_s13 = sphi %s770_s13, %s1013_s13   ;;  %s720_s12 = sphi %s768_s12, %s1012_s12  }
   0x7   : > { %p40_p0 = scmp.ne.s32.totalorder %s724_s13, %s720_s12  ;;  %p996_p1 = scmp.eq.s32.totalorder %s789_s16, 0 }
   0x8   : > { %p112_p3 = scmp.eq.s32.totalorder %s486_s17, 1  ;;  %p487_p5 = scmp.ge.s32.totalorder %s732_s15, 1 }
   0x9   : > { %p798_p4 = por %p996_p1, %p40_p0  ;;  %p119_p7 = scmp.lt.s32.totalorder %s732_s15, 3 }
   0xa   : > { %p803_p6 = por %p112_p3, %p40_p0  ;;  %s734_s21 = smov [#allocation5]  }
   0xb   : > { %s999_s18 = scalar_select %p798_p4, 1, 0 }
   0xc   : > { %s1000_s19 = scalar_select %p803_p6, 1, 0 }
   0xd   : > { %p808_p8 = pnand %p487_p5, %p119_p7  ;;  %s131_s22 = sshll.u32 %s734_s21, 4  ;;  %s812_s22 = int_to_ptr.vmem [resolvable:$true] %s131_s22 }
   0xe   : > { %s824_s24 = sadd.s32 1, %s732_s15   ;;  %s27_s25 = sadd.s32 1, %s728_s14 }
   0xf   : > { %s1001_s20 = scalar_select %p808_p8, 1, 0 }
  0x10   : > { %p540_p9 = pneg %p808_p8  ;;  %s24_s26 = ssub.s32 %s732_s15, %s824_s24 }
  0x11   : > { %s604_s29 = scalar_lea.hbm %s993_s1, 512 }
  0x12   : > { %p819_p11 = pnand %p540_p9, %p996_p1  ;;  %p605_p12 = scmp.ne.s32.totalorder %s993_s1, %s604_s29 }
  0x13   : > { %p611_p5 = scmp.lt.u32.totalorder %s604_s29, %s993_s1 }
  0x14   : > { %p606_p13 = pneg %p819_p11 }
  0x16   : > { %p607_p0 = pnand %p606_p13, %p605_p12 }
  0x18   : > { %p608_p3 = pneg %p607_p0 }
  0x1a   : > { %p613_p7 = pnand %p611_p5, %p608_p3 }
  0x1c   : > { %616 = shalt.err (!%p613_p7)
}
  0x1d   : > { %s617_s7 = scalar_lea.vmem %s812_s22, 512  ;;  %p625_p2 = scmp.lt.s32.totalorder %s812_s22, %s812_s22 }
  0x1e   : > { %p618_p9 = scmp.ne.s32.totalorder %s812_s22, %s617_s7  ;;  %p626_p6 = scmp.lt.s32.totalorder %s617_s7, %s617_s7 }
  0x20   : > { %p620_p10 = pnand %p618_p9, %p606_p13  ;;  %p627_p4 = por %p626_p6, %p625_p2 }
  0x22   : > { %p621_p1 = pneg %p620_p10 }
  0x24   : > { %p628_p8 = pnand %p627_p4, %p621_p1 }
  0x26   : > { %631 = shalt.err (!%p628_p8)
}
  0x27   : > { %s735_s8 = smov 128   ;;  %s736_s9 = smov 8  }
  0x28   : > { %543 = dma.hbm_to_vmem [thread:$0]  (!%p819_p11), %s993_s1, 512, %s812_s22, [#allocation6], %s735_s8, %s735_s8, %s736_s9  }
  0x29   : > { %p25_p2 = scmp.eq.s32.totalorder %s24_s26, 0  ;;  %p34_p1 = scmp.ne.s32.totalorder %s728_s14, %s724_s13 }
  0x2a   : > { %p35_p4 = scmp.eq.s32.totalorder %s732_s15, 0  ;;  %p553_p6 = scmp.lt.s32.totalorder %s732_s15, 2 }
  0x2b   : > { %s855_s17 = scalar_select %p25_p2, %s728_s14, %s27_s25  }
  0x2c   : > { %p36_p8 = por %p35_p4, %p34_p1  ;;  %p1003_p10 = scmp.eq.s32.totalorder %s789_s16, 1 }
  0x2d   : > { %s148_s27 = sand.u32 1, %s728_s14   ;;  %s491_s28 = sshll.u32 %s732_s15, 7 }
  0x2e   : > { %p859_p12 = por %p1003_p10, %p34_p1  ;;  %s490_s29 = sshll.u32 %s148_s27, 3 }
  0x2f   : > { %s868_s4 = scalar_lea.hbm %s992_s0, %s491_s28  ;;  %s152_s22 = scalar_lea.vmem [#allocation2], %s490_s29 }
  0x30   : > { %s159_s25 = sshll.u32 %s152_s22, 4  ;;  %p870_p11 = pnand %p553_p6, %p36_p8  ;;  %s874_s25 = int_to_ptr.vmem [resolvable:$true] %s159_s25 }
  0x31   : > { %s149_s5 = scalar_lea.sflag [#allocation3], %s148_s27  ;;  %s632_s6 = scalar_lea.hbm %s868_s4, 128 }
  0x32   : > { %p633_p13 = scmp.ne.s32.totalorder %s868_s4, %s632_s6  ;;  %p634_p0 = pneg %p870_p11 }
  0x33   : > { %s637_s9 = scalar_lea.hbm %s992_s0, 256  ;;  %p638_p7 = scmp.lt.u32.totalorder %s868_s4, %s992_s0 }
  0x34   : > { %p635_p3 = pnand %p634_p0, %p633_p13  ;;  %p639_p9 = scmp.lt.u32.totalorder %s637_s9, %s632_s6 }
  0x35   : > { %p641_p1 = scmp.lt.u32.totalorder %s632_s6, %s868_s4 }
  0x36   : > { %p636_p5 = pneg %p635_p3  ;;  %p640_p2 = por %p639_p9, %p638_p7 }
  0x38   : > { %p642_p4 = por %p641_p1, %p640_p2 }
  0x3a   : > { %p643_p6 = pnand %p642_p4, %p636_p5 }
  0x3c   : > { %646 = shalt.err (!%p643_p6)
}
  0x3d   : > { %s647_s27 = scalar_lea.vmem %s874_s25, 128  ;;  %s737_s28 = smov [#allocation2]  }
  0x3e   : > { %p648_p8 = scmp.ne.s32.totalorder %s874_s25, %s647_s27  ;;  %s652_s29 = sshll.u32 %s737_s28, 4  ;;  %s653_s29 = int_to_ptr.vmem [resolvable:$false] %s652_s29 }
  0x3f   : > { %s654_s23 = scalar_lea.vmem %s653_s29, 256  ;;  %p655_p3 = scmp.lt.s32.totalorder %s874_s25, %s653_s29 }
  0x40   : > { %p650_p10 = pnand %p648_p8, %p634_p0  ;;  %p656_p7 = scmp.lt.s32.totalorder %s654_s23, %s647_s27 }
  0x42   : > { %p651_p13 = pneg %p650_p10  ;;  %p657_p9 = por %p656_p7, %p655_p3 }
  0x44   : > { %p658_p2 = pnand %p657_p9, %p651_p13 }
  0x46   : > { %661 = shalt.err (!%p658_p2)
}
  0x47   : > { %547 = dma.hbm_to_vmem [thread:$0]  (!%p870_p11), %s868_s4, 128, %s874_s25, %s149_s5  }
  0x48   : > { %p1006_p5 = scmp.ne.s32.totalorder %s1001_s20, 0 }
  0x49   : > { %s904_s30 = sand.u32 (!%p1006_p5), 1, %s724_s13   ;;  %p1007_p0 = scmp.ne.s32.totalorder (!%p1006_p5), %s999_s18, 0 }
  0x4a   : > { %168 = sbr.rel (%p1006_p5) target bundleno = 402 (0x192), region = 32  ;;  %s493_s22 = sshll.u32 (!%p1006_p5), %s904_s30, 3 }
  0x4b   : > { %s171_s6 = scalar_lea.sflag (!%p1006_p5), [#allocation3], %s904_s30  ;;  %s174_s7 = scalar_lea.vmem (!%p1006_p5), [#allocation2], %s493_s22 }
  0x51   : > { %707 = dma.done.wait (%p1007_p0), %s171_s6, 128  }
  0x52   : > { %709 = vsyncadd (%p1007_p0), %s171_s6, 4294967168  ;;  %p1008_p11 = scmp.eq.s32.totalorder %s789_s16, 0 }
  0x54   : > { %711 = dma.done.wait (%p1008_p11), [#allocation6], 512   ;;  %p1009_p1 = pmov %p1008_p11 }
  0x55   : > { %v738_v0 = vmov 0.0|0.0   ;;  %vm739_vm0 = vmmov 0   ;;  %v740_v1 = vmov 0.0   ;;  %v202_v2 = vld [vmem:[#allocation5] sm:$0xff]  ;;  %v203_v3 = vld [vmem:[#allocation5 + $0x8] sm:$0xff]  ;;  %v204_v4 = vld [vmem:[#allocation5 + $0x10] sm:$0xff] }
  0x56   : > { %713 = vsyncadd (%p1009_p1), [#allocation6], 4294966784  ;;  %522 = vmatprep.subr.bf16.mxu0 %v738_v0  ;;  %519 = vmatprep.mubr.msk.f32.mxu0 %vm739_vm0, %v740_v1  ;;  %v523_v5 = vpack.c.bf16 %v203_v3, %v202_v2  ;;  %v205_v6 = vld [vmem:[#allocation5 + $0x18] sm:$0xff]  ;;  %vm213_vm1 = vcmask 261120   ;;  %v496_v9 = vld [vmem:[%s994_s2] ss:$0 sm:$0xff] }
  0x57   : > { %v526_v7 = vpack.c.bf16 %v205_v6, %v204_v4  ;;  %v201_v8 = vld [vmem:[%s174_s7] sm:$0xff]  ;;  %v741_v23 = vmov 683565275   ;;  %v742_v25 = vmov 2475754826   ;;  %s503_s4 = sshll.u32 %s789_s16, 7 }
  0x58   : > { %524 = vmatpush3.bf16.msra.mxu0 %v523_v5  ;;  %v743_v28 = vmov 2131351028   ;;  %v744_v31 = vmov 2102212464   ;;  %v745_v34 = vmov 920167782   ;;  %s948_s9 = scalar_lea.hbm %s995_s3, %s503_s4 }
  0x59   : > { %525 = vmatprep.subr.bf16.mxu0 %v738_v0  ;;  %v746_v37 = vmov 1326507024   ;;  %s200_s25 = scalar_lea.vmem [#allocation7], %s493_s22  ;;  %s393_s16 = scalar_lea.sflag [#allocation4], %s904_s30 }
  0x5a   : > { %s406_s26 = sshll.u32 %s200_s25, 4  ;;  %s747_s11 = smov [#allocation7]   ;;  %s950_s26 = int_to_ptr.vmem [resolvable:$true] %s406_s26 }
  0x5b   : > { %s662_s10 = scalar_lea.vmem %s950_s26, 128  ;;  %s666_s27 = sshll.u32 %s747_s11, 4  ;;  %s667_s27 = int_to_ptr.vmem [resolvable:$false] %s666_s27 }
  0x5c   : > { %527 = vmatpush3.bf16.msra.mxu0 %v526_v7  ;;  %p663_p4 = scmp.ne.s32.totalorder %s950_s26, %s662_s10  ;;  %s668_s28 = scalar_lea.vmem %s667_s27, 256 }
  0x5d   : > { %p669_p10 = scmp.lt.s32.totalorder %s950_s26, %s667_s27  ;;  %p670_p13 = scmp.lt.s32.totalorder %s668_s28, %s662_s10 }
  0x5e   : > { %p664_p6 = pnand %p663_p4, %p859_p12 }
  0x5f   : > { %520 = vmatmul.mubr.msk.f32.vlgmr.msra.gmra.mrb[0].mxu0 %vm213_vm1, %v201_v8  ;;  %p671_p3 = por %p670_p13, %p669_p10 }
  0x60   : > { %p665_p8 = pneg %p664_p6 }
  0x62   : > { %p672_p7 = pnand %p671_p3, %p665_p8 }
 0x132   : > { %v283_v10 = vpop.f32.mrb[0].mxu0 }
 0x133   : > { %v921_v11 = vadd.f32 %v496_v9, %v283_v10  ;;  %v521_v12 = vpop.f32.mrb[1].mxu0 }
 0x135   : > { %v290_v13 = vand.u32 2139095040, %v921_v11  ;;  %v287_v17 = vand.u32 2147483647, %v921_v11  ;;  %vm289_vm9 = vcmp.lt.s32.totalorder %v921_v11, 0  ;;  %vm379_vm14 = vweird.f32 %v921_v11 }
 0x137   : > { %v291_v14 = vshrl.u32 %v290_v13, 23  ;;  %v294_v20 = vand.u32 8388607, %v287_v17  ;;  %vm288_vm10 = vcmp.le.f32.partialorder %v287_v17, 0.7853982 }
 0x139   : > { %v498_v15 = vadd.s32 4294967169, %v291_v14  ;;  %v295_v39 = vor.u32 8388608, %v294_v20 }
 0x13b   : > { %v297_v16 = vadd.s32 1, %v498_v15  ;;  %v335_v53 = vshll.u32 %v295_v39, 8 }
 0x13d   : > { %vm298_vm2 = vcmp.gt.s32.totalorder %v297_v16, 0 }
 0x13e   : > { %v299_v18 = vsel %vm298_vm2, %v297_v16, 0 }
 0x13f   : > { %v301_v19 = vand.u32 31, %v299_v18  ;;  %v300_v22 = vshrl.u32 %v299_v18, 5 }
 0x141   : > { %v302_v21 = vsub.s32 32, %v301_v19  ;;  %v304_v24 = vshll.u32 %v741_v23, %v301_v19  ;;  %v307_v26 = vshll.u32 %v742_v25, %v301_v19  ;;  %v310_v30 = vshll.u32 %v743_v28, %v301_v19 }
 0x142   : > { %v313_v33 = vshll.u32 %v744_v31, %v301_v19  ;;  %v316_v36 = vshll.u32 %v745_v34, %v301_v19  ;;  %vm319_vm3 = vcmp.lt.s32.totalorder %v300_v22, 1  ;;  %vm322_vm4 = vcmp.lt.s32.totalorder %v300_v22, 4 }
 0x143   : > { %v305_v27 = vshrl.u32 %v742_v25, %v302_v21  ;;  %v308_v29 = vshrl.u32 %v743_v28, %v302_v21  ;;  %v311_v32 = vshrl.u32 %v744_v31, %v302_v21  ;;  %v314_v35 = vshrl.u32 %v745_v34, %v302_v21 }
 0x144   : > { %v317_v38 = vshrl.u32 %v746_v37, %v302_v21  ;;  %v303_v48 = vshrl.u32 %v741_v23, %v302_v21  ;;  %vm321_vm5 = vcmp.lt.s32.totalorder %v300_v22, 3  ;;  %vm320_vm6 = vcmp.lt.s32.totalorder %v300_v22, 2 }
 0x145   : > { %v306_v40 = vor.u32 %v305_v27, %v304_v24  ;;  %v309_v41 = vor.u32 %v308_v29, %v307_v26  ;;  %v312_v42 = vor.u32 %v311_v32, %v310_v30  ;;  %v315_v43 = vor.u32 %v314_v35, %v313_v33 }
 0x146   : > { %v318_v44 = vor.u32 %v317_v38, %v316_v36 }
 0x147   : > { %v324_v45 = vsel %vm322_vm4, %v312_v42, 2102212464  ;;  %v327_v46 = vsel %vm319_vm3, %v306_v40, %v309_v41  ;;  %v331_v47 = vsel %vm319_vm3, %v309_v41, %v312_v42  ;;  %v328_v49 = vsel %vm322_vm4, %v315_v43, 920167782 }
 0x148   : > { %v332_v50 = vsel %vm322_vm4, %v318_v44, 1326507024  ;;  %v329_v51 = vsel %vm321_vm5, %v312_v42, %v328_v49  ;;  %v323_v54 = vsel %vm319_vm3, %v303_v48, %v306_v40  ;;  %v325_v55 = vsel %vm321_vm5, %v309_v41, %v324_v45 }
 0x149   : > { %v333_v52 = vsel %vm321_vm5, %v315_v43, %v332_v50  ;;  %v330_v56 = vsel %vm320_vm6, %v327_v46, %v329_v51  ;;  %v326_v62 = vsel %vm320_vm6, %v323_v54, %v325_v55 }
 0x14a   : > { %v334_v57 = vsel %vm320_vm6, %v331_v47, %v333_v52  ;;  %v930_v60 = vmul.u32.u64.low %v335_v53, %v330_v56  ;;  %v931_v61 = vmul.u32.u64.high %v335_v53, %v330_v56, %v930_v60  ;;  %v342_v0 = vmul.u32 %v335_v53, %v326_v62 }
 0x14b   : > { %v927_v58 = vmul.u32.u64.low %v335_v53, %v334_v57  ;;  %v928_v59 = vmul.u32.u64.high %v335_v53, %v334_v57, %v927_v58 }
 0x14c   : > { %v345_v63 = vadd.s32 1, %v931_v61 }
 0x14d   : > { %vm344_vm7 = vc.u32 %v928_v59, %v930_v60  ;;  %v343_v13 = vadd.s32 %v930_v60, %v928_v59 }
 0x14e   : > { %v346_v1 = vsel %vm344_vm7, %v345_v63, %v931_v61 }
 0x14f   : > { %v347_v2 = vadd.s32 %v346_v1, %v342_v0 }
 0x151   : > { %v348_v3 = vadd.s32 536870912, %v347_v2 }
 0x153   : > { %v349_v4 = vshrl.u32 %v348_v3, 30 }
 0x155   : > { %v350_v5 = vshll.u32 %v349_v4, 30  ;;  %v373_v26 = vsub.s32 4, %v349_v4 }
 0x157   : > { %v351_v6 = vsub.s32 %v347_v2, %v350_v5  ;;  %v374_v29 = vsel %vm289_vm9, %v373_v26, %v349_v4 }
 0x158   : > { %v376_v31 = vsel %vm288_vm10, 0, %v374_v29 }
 0x159   : > { %v353_v7 = vsub.s32 0, %v351_v6  ;;  %v380_v32 = vadd.s32 3, %v376_v31 }
 0x15b   : > { %v499_v8 = vmin.u32 %v353_v7, %v351_v6  ;;  %v381_v33 = vand.u32 3, %v380_v32 }
 0x15d   : > { %v355_v9 = vclz %v499_v8  ;;  %vm386_vm11 = vcmp.eq.s32.totalorder %v381_v33, 2  ;;  %vm383_vm12 = vcmp.eq.s32.totalorder %v381_v33, 0  ;;  %vm382_vm13 = vcmp.lt.s32.totalorder %v381_v33, 2 }
 0x15f   : > { %v500_v10 = vadd.s32 4294967294, %v355_v9 }
 0x161   : > { %vm501_vm8 = vcmp.lt.s32.totalorder %v500_v10, 0 }
 0x162   : > { %v358_v12 = vsel %vm501_vm8, 0, %v500_v10 }
 0x163   : > { %v359_v14 = vsub.s32 32, %v358_v12  ;;  %v363_v15 = vsub.s32 4294967266, %v358_v12  ;;  %v360_v16 = vshll.u32 %v351_v6, %v358_v12 }
 0x165   : > { %v361_v18 = vshrl.u32 %v343_v13, %v359_v14  ;;  %v364_v19 = vadd.s32 127, %v363_v15 }
 0x167   : > { %v362_v20 = vor.u32 %v361_v18, %v360_v16  ;;  %v365_v21 = vshll.u32 %v364_v19, 23 }
 0x169   : > { %v366_v22 = vor.u32 4788187, %v365_v21  ;;  %v369_v24 = vcvt.s32.f32 %v362_v20 }
 0x16b   : > { %v367_v23 = vand.u32 2147483647, %v366_v22 }
 0x16d   : > { %v370_v25 = vmul.f32 %v369_v24, %v367_v23 }
 0x16f   : > { %v371_v27 = vxor.u32 2147483648, %v370_v25 }
 0x171   : > { %v372_v28 = vsel %vm289_vm9, %v371_v27, %v370_v25 }
 0x172   : > { %v375_v30 = vsel %vm288_vm10, %v921_v11, %v372_v28 }
 0x173   : > { %600 = vcosq.f32 %v375_v30 }
 0x174   : > { %602 = vsinq.f32 %v375_v30 }
 0x17d   : > { %v601_v34 = vpop.eup %600 }
 0x17e   : > { %v603_v35 = vpop.eup %602  ;;  %v387_v36 = vxor.u32 2147483648, %v601_v34 }
 0x17f   : > { %v384_v37 = vxor.u32 2147483648, %v603_v35 }
 0x180   : > { %v388_v17 = vsel %vm386_vm11, %v387_v36, %v603_v35 }
 0x181   : > { %v385_v38 = vsel %vm383_vm12, %v601_v34, %v384_v37 }
 0x182   : > { %v389_v39 = vsel %vm382_vm13, %v385_v38, %v388_v17 }
 0x183   : > { %v390_v40 = vsel %vm379_vm14, nan, %v389_v39 }
 0x184   : > { %391 = vst [vmem:[%s200_s25] sm:$0xff] %v390_v40 }
 0x185   : > { %675 = shalt.err (!%p672_p7)
}
 0x186   : > { %s676_s29 = scalar_lea.hbm %s948_s9, 128  ;;  %s680_s22 = scalar_lea.hbm %s995_s3, 256 }
 0x187   : > { %p677_p9 = scmp.ne.s32.totalorder %s948_s9, %s676_s29  ;;  %p681_p0 = scmp.lt.u32.totalorder %s948_s9, %s995_s3 }
 0x188   : > { %p682_p11 = scmp.lt.u32.totalorder %s680_s22, %s676_s29  ;;  %p684_p4 = scmp.lt.u32.totalorder %s676_s29, %s948_s9 }
 0x189   : > { %p678_p2 = pnand %p677_p9, %p859_p12 }
 0x18a   : > { %p683_p1 = por %p682_p11, %p681_p0 }
 0x18b   : > { %p679_p5 = pneg %p678_p2 }
 0x18c   : > { %p685_p6 = por %p684_p4, %p683_p1 }
 0x18e   : > { %p686_p8 = pnand %p685_p6, %p679_p5 }
 0x190   : > { %689 = shalt.err (!%p686_p8)
}
 0x191   : > { %538 = dma.vmem_to_hbm [thread:$0]  (%p859_p12), %s950_s26, 128, %s948_s9, %s393_s16  }
 0x192 PF: > { %s418_s18 = sand.u32 1, %s720_s12   ;;  %p1010_p10 = scmp.ne.s32.totalorder %s1000_s19, 0 }
 0x193   : > { %p1011_p13 = scmp.ge.s32.totalorder %s732_s15, 2  ;;  %s419_s20 = scalar_lea.sflag [#allocation4], %s418_s18 }
 0x195   : > { %p549_p3 = pnand %p1011_p13, %p1010_p10 }
 0x197   : > { %715 = dma.done.wait (!%p549_p3), %s419_s20, 128  }
 0x198   : > { %717 = vsyncadd (!%p549_p3), %s419_s20, 4294967168  ;;  %p17_p7 = scmp.ge.s32.totalorder %s824_s24, 4   ;;  %s1012_s12 = smov %s724_s13 }
 0x199   : > { %s1013_s13 = smov %s728_s14  ;;  %s1014_s14 = smov %s855_s17 }
 0x19a   : > { %s1015_s15 = smov %s824_s24  ;;  %19 = sbr.rel (!%p17_p7) target bundleno = 6 (0x6), region = 81 }
 0x1a1   :  { %424 = vsyncpa [#allocation3], 1 }
 0x1a2   :  { %426 = vsyncpa [#allocation3 + $0x1], 1 }
 0x1a3   :  { %427 = vsyncpa [#allocation6], 1 }
 0x1a4   :  { %428 = vsyncpa [#allocation4], 1 }
 0x1a5   :  { %430 = vsyncpa [#allocation4 + $0x1], 1 }

</bundles_post_ra>
